<compile_context>
chip_gen: v6e
topology: v6e:2x2x1
jax: 0.10.0
libtpu: 0.0.40
codegen_flags: <defaults>
</compile_context>

<pallas_src>
from functools import partial

import jax
import jax.numpy as jnp
from jax.experimental import pallas as pl
from jax.experimental.pallas import tpu as pltpu

EMBED_DIM = 16
VOCAB_USER = 32
VOCAB_ITEM = 24
VOCAB_SEQ = 40
SEQ_LEN = 8
N_DENSE = 1
PADDING_IDX = 0
OUT_DIM = 3 * EMBED_DIM + N_DENSE          # 49 real output columns

# fused / padded layout
K_PAD = 128                                # contraction dim (fills MXU depth)
N_PAD = 64                                 # lane-dense output width
OFF_USER = 0
OFF_ITEM = VOCAB_USER                      # 32
OFF_SEQ = VOCAB_USER + VOCAB_ITEM          # 56
ROW_NULL = K_PAD - 1                       # 127, an all-zero table row (padding ids)
COL_DENSE = 3 * EMBED_DIM                  # 48  (output column for dense)

# packed-input lane layout: [user, item, seq*8, dense_bits, pad*5]
PACK_W = 16
LANE_USER = 0
LANE_ITEM = 1
LANE_SEQ0 = 2
LANE_DENSE = 2 + SEQ_LEN                   # 10


def _round_up(x, m):
    return ((x + m - 1) // m) * m


def embedding_layer_kernel(packed_ref, table_ref, out_ref):
    packed = packed_ref[...]                                   # (TB, 16) int32
    tb = packed.shape[0]

    user = packed[:, LANE_USER:LANE_USER + 1] + OFF_USER       # (TB, 1)
    item = packed[:, LANE_ITEM:LANE_ITEM + 1] + OFF_ITEM       # (TB, 1)
    dense = pltpu.bitcast(packed[:, LANE_DENSE:LANE_DENSE + 1],
                          jnp.float32)                         # (TB, 1) f32

    lane = jax.lax.broadcasted_iota(jnp.int32, (tb, K_PAD), 1)  # (TB, 128)

    # user/item one-hots merged: ranges are disjoint, so OR is exact (one cast)
    oh = ((lane == user) | (lane == item)).astype(jnp.float32)  # (TB, 128)

    # sequence feature: padding mask folded into the routed id (pad -> null row
    # 127, whose table row is zero).  Pure 2-D VPU compare-and-adds, no full
    # width mask multiplies.  Duplicated ids simply accumulate (sum pool).
    counts = jnp.zeros((tb, 1), jnp.float32)
    for s in range(SEQ_LEN):
        sid = packed[:, LANE_SEQ0 + s:LANE_SEQ0 + s + 1]        # (TB, 1)
        is_pad = sid == PADDING_IDX                             # (TB, 1) bool
        sid_r = jnp.where(is_pad, ROW_NULL, sid + OFF_SEQ)      # (TB, 1)
        oh = oh + (lane == sid_r).astype(jnp.float32)
        counts = counts + jnp.where(is_pad, 0.0, 1.0)

    # one aligned (TB,128)@(128,64) MXU pass; `oh` holds exact small integers,
    # precision pinned so the f32 table is reproduced exactly.
    acc = jnp.dot(oh, table_ref[...],
                  precision=jax.lax.Precision.HIGHEST,
                  preferred_element_type=jnp.float32)           # (TB, 64)

    # post-matmul: mean-pool scaling on the 16 sequence columns only, and the
    # dense value routed around the MXU into column 48 (constant column masks).
    col = jax.lax.broadcasted_iota(jnp.int32, (1, N_PAD), 1)    # (1, 64)
    is_seq_col = (col >= 2 * EMBED_DIM) & (col < 3 * EMBED_DIM)
    is_dense_col = (col == COL_DENSE).astype(jnp.float32)

    inv = pl.reciprocal(counts + 1e-16, approx=False)           # (TB, 1) exact
    acc = acc * jnp.where(is_seq_col, inv, 1.0)                 # (TB, 64)
    acc = acc + dense * is_dense_col                            # (TB, 64)

    out_ref[...] = acc                                          # lane-dense store


def build_fused_table(tab_user, tab_item, tab_seq):
    """Block-diagonal fused table, zero-padded to (128, 64).

    Built once per weight update (hoisted out of the per-step forward)."""
    table = jnp.zeros((K_PAD, N_PAD), jnp.float32)
    table = table.at[OFF_USER:OFF_USER + VOCAB_USER, 0:EMBED_DIM].set(
        tab_user.astype(jnp.float32))
    table = table.at[OFF_ITEM:OFF_ITEM + VOCAB_ITEM,
                     EMBED_DIM:2 * EMBED_DIM].set(tab_item.astype(jnp.float32))
    table = table.at[OFF_SEQ:OFF_SEQ + VOCAB_SEQ,
                     2 * EMBED_DIM:3 * EMBED_DIM].set(tab_seq.astype(jnp.float32))
    return table


def _choose_tile(B, max_tile):
    tb = min(max_tile, _round_up(B, 8))
    if B > 256:
        # keep >=2 grid steps so dimension_semantics=("parallel",) can shard
        # the batch axis across both v7x TensorCores.
        tb = min(tb, _round_up(-(-B // 2), 8))
    return tb


@partial(jax.jit, static_argnames=("max_tile",))
def embedding_layer_forward(ids_user, ids_item, seq_ids, dense, table,
                            max_tile=2048):
    B = ids_user.shape[0]

    # ---- coalesce all per-example inputs into one (B, 16) int32 block
    dense_bits = jax.lax.bitcast_convert_type(
        dense.astype(jnp.float32), jnp.int32)[:, None]
    packed = jnp.concatenate(
        [ids_user.astype(jnp.int32)[:, None],
         ids_item.astype(jnp.int32)[:, None],
         seq_ids.astype(jnp.int32),
         dense_bits,
         jnp.zeros((B, PACK_W - LANE_DENSE - 1), jnp.int32)], axis=1)

    # ---- batch tiling: TB multiple of 8, capped; zero-pad the tail tile
    TB = _choose_tile(B, max_tile)
    B_pad = _round_up(B, TB)
    if B_pad != B:
        packed = jnp.pad(packed, ((0, B_pad - B), (0, 0)))
    grid = (B_pad // TB,)

    out_padded = pl.pallas_call(
        embedding_layer_kernel,
        out_shape=jax.ShapeDtypeStruct((B_pad, N_PAD), jnp.float32),
        grid=grid,
        in_specs=[
            pl.BlockSpec((TB, PACK_W), lambda i: (i, 0)),
            pl.BlockSpec((K_PAD, N_PAD), lambda i: (0, 0)),
        ],
        out_specs=pl.BlockSpec((TB, N_PAD), lambda i: (i, 0)),
        compiler_params=pltpu.CompilerParams(
            dimension_semantics=("parallel",),
            vmem_limit_bytes=32 * 1024 * 1024),
    )(packed, table)

    # drop batch / lane padding
    return out_padded[:B, :OUT_DIM]


def reference_forward(ids_user, ids_item, seq_ids, dense,
                      tab_user, tab_item, tab_seq):
    B = ids_user.shape[0]
    e_user = tab_user[ids_user]
    e_item = tab_item[ids_item]
    seq_emb = tab_seq[seq_ids]                                   # (B, S, D)
    mask = (seq_ids != PADDING_IDX).astype(jnp.float32)          # (B, S)
    pooled = (seq_emb * mask[:, :, None]).sum(axis=1) / (
        mask.sum(axis=1, keepdims=True) + 1e-16)
    sparse = jnp.concatenate(
        [e_user[:, None, :], e_item[:, None, :], pooled[:, None, :]], axis=1)
    return jnp.concatenate(
        [sparse.reshape(B, -1), dense.reshape(B, N_DENSE).astype(jnp.float32)],
        axis=1)


if __name__ == "__main__":
    B = 8
    key = jax.random.PRNGKey(0)
    k1, k2, k3, k4, k5, k6, k7 = jax.random.split(key, 7)

    # deterministic "nn.Embedding" tables
    tab_user = jax.random.normal(k1, (VOCAB_USER, EMBED_DIM), jnp.float32)
    tab_item = jax.random.normal(k2, (VOCAB_ITEM, EMBED_DIM), jnp.float32)
    tab_seq = jax.random.normal(k3, (VOCAB_SEQ, EMBED_DIM), jnp.float32)

    # inputs x = {feature_name: value}
    ids_user = jax.random.randint(k4, (B,), 1, VOCAB_USER, jnp.int32)
    ids_item = jax.random.randint(k5, (B,), 1, VOCAB_ITEM, jnp.int32)
    seq_ids = jax.random.randint(k6, (B, SEQ_LEN), 0, VOCAB_SEQ, jnp.int32)
    seq_ids = seq_ids.at[:, 0].set(
        jnp.maximum(seq_ids[:, 0], 1))  # ensure >=1 non-padding token per row
    dense = jax.random.normal(k7, (B,), jnp.float32)

    # fused table built once per weight update, outside the forward pass
    table = build_fused_table(tab_user, tab_item, tab_seq)

    out = embedding_layer_forward(ids_user, ids_item, seq_ids, dense, table)
    out = jax.block_until_ready(out)

    ref = reference_forward(ids_user, ids_item, seq_ids, dense,
                            tab_user, tab_item, tab_seq)
    assert out.shape == (B, OUT_DIM), out.shape
    assert jnp.allclose(out, ref, atol=1e-5, rtol=1e-5), \
        float(jnp.max(jnp.abs(out - ref)))

    print("KERNEL_OK")
</pallas_src>

<mosaic_0001>
module attributes {stable_mosaic.version = 11 : i64} {
  func.func @embedding_layer_kernel(%arg0: i32, %arg1: memref<8x16xi32, #tpu.memory_space<vmem>>, %arg2: memref<128x64xf32, #tpu.memory_space<vmem>>, %arg3: memref<8x64xf32, #tpu.memory_space<vmem>>) attributes {dimension_semantics = [#tpu.dimension_semantics<parallel>], iteration_bounds = array<i64: 1>, scalar_prefetch = 0 : i64, scratch_operands = 0 : i64, tpu.core_type = #tpu.core_type<tc>, window_params = [{transform_indices = @transform_0, window_bounds = array<i64: 8, 16>}, {pipeline_mode = #tpu.pipeline_mode<synchronous>, transform_indices = @transform_1, window_bounds = array<i64: 128, 64>}, {transform_indices = @transform_2, window_bounds = array<i64: 8, 64>}]} {
    %c0 = arith.constant 0 : index
    %c0_0 = arith.constant 0 : index
    %0 = vector.load %arg1[%c0, %c0_0] : memref<8x16xi32, #tpu.memory_space<vmem>>, vector<8x16xi32>
    %1 = vector.extract_strided_slice %0 {offsets = [0, 0], sizes = [8, 1], strides = [1, 1]} : vector<8x16xi32> to vector<8x1xi32>
    %c0_i32 = arith.constant 0 : i32
    %2 = vector.broadcast %c0_i32 : i32 to vector<8x1xi32>
    %3 = arith.addi %1, %2 : vector<8x1xi32>
    %4 = vector.extract_strided_slice %0 {offsets = [0, 1], sizes = [8, 1], strides = [1, 1]} : vector<8x16xi32> to vector<8x1xi32>
    %c32_i32 = arith.constant 32 : i32
    %5 = vector.broadcast %c32_i32 : i32 to vector<8x1xi32>
    %6 = arith.addi %4, %5 : vector<8x1xi32>
    %7 = vector.extract_strided_slice %0 {offsets = [0, 10], sizes = [8, 1], strides = [1, 1]} : vector<8x16xi32> to vector<8x1xi32>
    %8 = tpu.bitcast %7 : vector<8x1xi32> -> vector<8x1xf32>
    %9 = tpu.iota {dimensions = array<i32: 1>} : vector<8x128xi32>
    %10 = vector.broadcast %3 : vector<8x1xi32> to vector<8x128xi32>
    %11 = arith.cmpi eq, %9, %10 : vector<8x128xi32>
    %12 = vector.broadcast %6 : vector<8x1xi32> to vector<8x128xi32>
    %13 = arith.cmpi eq, %9, %12 : vector<8x128xi32>
    %14 = arith.ori %11, %13 : vector<8x128xi1>
    %15 = arith.extui %14 : vector<8x128xi1> to vector<8x128xi32>
    %16 = arith.sitofp %15 : vector<8x128xi32> to vector<8x128xf32>
    %cst = arith.constant 0.000000e+00 : f32
    %17 = vector.broadcast %cst : f32 to vector<8x1xf32>
    %18 = vector.extract_strided_slice %0 {offsets = [0, 2], sizes = [8, 1], strides = [1, 1]} : vector<8x16xi32> to vector<8x1xi32>
    %c0_i32_1 = arith.constant 0 : i32
    %19 = vector.broadcast %c0_i32_1 : i32 to vector<8x1xi32>
    %20 = arith.cmpi eq, %18, %19 : vector<8x1xi32>
    %c56_i32 = arith.constant 56 : i32
    %21 = vector.broadcast %c56_i32 : i32 to vector<8x1xi32>
    %22 = arith.addi %18, %21 : vector<8x1xi32>
    %c127_i32 = arith.constant 127 : i32
    %23 = vector.broadcast %c127_i32 : i32 to vector<8x1xi32>
    %24 = arith.select %20, %23, %22 : vector<8x1xi1>, vector<8x1xi32>
    %25 = vector.broadcast %24 : vector<8x1xi32> to vector<8x128xi32>
    %26 = arith.cmpi eq, %9, %25 : vector<8x128xi32>
    %27 = arith.extui %26 : vector<8x128xi1> to vector<8x128xi32>
    %28 = arith.sitofp %27 : vector<8x128xi32> to vector<8x128xf32>
    %29 = arith.addf %16, %28 : vector<8x128xf32>
    %cst_2 = arith.constant 0.000000e+00 : f32
    %cst_3 = arith.constant 1.000000e+00 : f32
    %30 = vector.broadcast %cst_2 : f32 to vector<8x1xf32>
    %31 = vector.broadcast %cst_3 : f32 to vector<8x1xf32>
    %32 = arith.select %20, %30, %31 : vector<8x1xi1>, vector<8x1xf32>
    %33 = arith.addf %17, %32 : vector<8x1xf32>
    %34 = vector.extract_strided_slice %0 {offsets = [0, 3], sizes = [8, 1], strides = [1, 1]} : vector<8x16xi32> to vector<8x1xi32>
    %c0_i32_4 = arith.constant 0 : i32
    %35 = vector.broadcast %c0_i32_4 : i32 to vector<8x1xi32>
    %36 = arith.cmpi eq, %34, %35 : vector<8x1xi32>
    %c56_i32_5 = arith.constant 56 : i32
    %37 = vector.broadcast %c56_i32_5 : i32 to vector<8x1xi32>
    %38 = arith.addi %34, %37 : vector<8x1xi32>
    %c127_i32_6 = arith.constant 127 : i32
    %39 = vector.broadcast %c127_i32_6 : i32 to vector<8x1xi32>
    %40 = arith.select %36, %39, %38 : vector<8x1xi1>, vector<8x1xi32>
    %41 = vector.broadcast %40 : vector<8x1xi32> to vector<8x128xi32>
    %42 = arith.cmpi eq, %9, %41 : vector<8x128xi32>
    %43 = arith.extui %42 : vector<8x128xi1> to vector<8x128xi32>
    %44 = arith.sitofp %43 : vector<8x128xi32> to vector<8x128xf32>
    %45 = arith.addf %29, %44 : vector<8x128xf32>
    %cst_7 = arith.constant 0.000000e+00 : f32
    %cst_8 = arith.constant 1.000000e+00 : f32
    %46 = vector.broadcast %cst_7 : f32 to vector<8x1xf32>
    %47 = vector.broadcast %cst_8 : f32 to vector<8x1xf32>
    %48 = arith.select %36, %46, %47 : vector<8x1xi1>, vector<8x1xf32>
    %49 = arith.addf %33, %48 : vector<8x1xf32>
    %50 = vector.extract_strided_slice %0 {offsets = [0, 4], sizes = [8, 1], strides = [1, 1]} : vector<8x16xi32> to vector<8x1xi32>
    %c0_i32_9 = arith.constant 0 : i32
    %51 = vector.broadcast %c0_i32_9 : i32 to vector<8x1xi32>
    %52 = arith.cmpi eq, %50, %51 : vector<8x1xi32>
    %c56_i32_10 = arith.constant 56 : i32
    %53 = vector.broadcast %c56_i32_10 : i32 to vector<8x1xi32>
    %54 = arith.addi %50, %53 : vector<8x1xi32>
    %c127_i32_11 = arith.constant 127 : i32
    %55 = vector.broadcast %c127_i32_11 : i32 to vector<8x1xi32>
    %56 = arith.select %52, %55, %54 : vector<8x1xi1>, vector<8x1xi32>
    %57 = vector.broadcast %56 : vector<8x1xi32> to vector<8x128xi32>
    %58 = arith.cmpi eq, %9, %57 : vector<8x128xi32>
    %59 = arith.extui %58 : vector<8x128xi1> to vector<8x128xi32>
    %60 = arith.sitofp %59 : vector<8x128xi32> to vector<8x128xf32>
    %61 = arith.addf %45, %60 : vector<8x128xf32>
    %cst_12 = arith.constant 0.000000e+00 : f32
    %cst_13 = arith.constant 1.000000e+00 : f32
    %62 = vector.broadcast %cst_12 : f32 to vector<8x1xf32>
    %63 = vector.broadcast %cst_13 : f32 to vector<8x1xf32>
    %64 = arith.select %52, %62, %63 : vector<8x1xi1>, vector<8x1xf32>
    %65 = arith.addf %49, %64 : vector<8x1xf32>
    %66 = vector.extract_strided_slice %0 {offsets = [0, 5], sizes = [8, 1], strides = [1, 1]} : vector<8x16xi32> to vector<8x1xi32>
    %c0_i32_14 = arith.constant 0 : i32
    %67 = vector.broadcast %c0_i32_14 : i32 to vector<8x1xi32>
    %68 = arith.cmpi eq, %66, %67 : vector<8x1xi32>
    %c56_i32_15 = arith.constant 56 : i32
    %69 = vector.broadcast %c56_i32_15 : i32 to vector<8x1xi32>
    %70 = arith.addi %66, %69 : vector<8x1xi32>
    %c127_i32_16 = arith.constant 127 : i32
    %71 = vector.broadcast %c127_i32_16 : i32 to vector<8x1xi32>
    %72 = arith.select %68, %71, %70 : vector<8x1xi1>, vector<8x1xi32>
    %73 = vector.broadcast %72 : vector<8x1xi32> to vector<8x128xi32>
    %74 = arith.cmpi eq, %9, %73 : vector<8x128xi32>
    %75 = arith.extui %74 : vector<8x128xi1> to vector<8x128xi32>
    %76 = arith.sitofp %75 : vector<8x128xi32> to vector<8x128xf32>
    %77 = arith.addf %61, %76 : vector<8x128xf32>
    %cst_17 = arith.constant 0.000000e+00 : f32
    %cst_18 = arith.constant 1.000000e+00 : f32
    %78 = vector.broadcast %cst_17 : f32 to vector<8x1xf32>
    %79 = vector.broadcast %cst_18 : f32 to vector<8x1xf32>
    %80 = arith.select %68, %78, %79 : vector<8x1xi1>, vector<8x1xf32>
    %81 = arith.addf %65, %80 : vector<8x1xf32>
    %82 = vector.extract_strided_slice %0 {offsets = [0, 6], sizes = [8, 1], strides = [1, 1]} : vector<8x16xi32> to vector<8x1xi32>
    %c0_i32_19 = arith.constant 0 : i32
    %83 = vector.broadcast %c0_i32_19 : i32 to vector<8x1xi32>
    %84 = arith.cmpi eq, %82, %83 : vector<8x1xi32>
    %c56_i32_20 = arith.constant 56 : i32
    %85 = vector.broadcast %c56_i32_20 : i32 to vector<8x1xi32>
    %86 = arith.addi %82, %85 : vector<8x1xi32>
    %c127_i32_21 = arith.constant 127 : i32
    %87 = vector.broadcast %c127_i32_21 : i32 to vector<8x1xi32>
    %88 = arith.select %84, %87, %86 : vector<8x1xi1>, vector<8x1xi32>
    %89 = vector.broadcast %88 : vector<8x1xi32> to vector<8x128xi32>
    %90 = arith.cmpi eq, %9, %89 : vector<8x128xi32>
    %91 = arith.extui %90 : vector<8x128xi1> to vector<8x128xi32>
    %92 = arith.sitofp %91 : vector<8x128xi32> to vector<8x128xf32>
    %93 = arith.addf %77, %92 : vector<8x128xf32>
    %cst_22 = arith.constant 0.000000e+00 : f32
    %cst_23 = arith.constant 1.000000e+00 : f32
    %94 = vector.broadcast %cst_22 : f32 to vector<8x1xf32>
    %95 = vector.broadcast %cst_23 : f32 to vector<8x1xf32>
    %96 = arith.select %84, %94, %95 : vector<8x1xi1>, vector<8x1xf32>
    %97 = arith.addf %81, %96 : vector<8x1xf32>
    %98 = vector.extract_strided_slice %0 {offsets = [0, 7], sizes = [8, 1], strides = [1, 1]} : vector<8x16xi32> to vector<8x1xi32>
    %c0_i32_24 = arith.constant 0 : i32
    %99 = vector.broadcast %c0_i32_24 : i32 to vector<8x1xi32>
    %100 = arith.cmpi eq, %98, %99 : vector<8x1xi32>
    %c56_i32_25 = arith.constant 56 : i32
    %101 = vector.broadcast %c56_i32_25 : i32 to vector<8x1xi32>
    %102 = arith.addi %98, %101 : vector<8x1xi32>
    %c127_i32_26 = arith.constant 127 : i32
    %103 = vector.broadcast %c127_i32_26 : i32 to vector<8x1xi32>
    %104 = arith.select %100, %103, %102 : vector<8x1xi1>, vector<8x1xi32>
    %105 = vector.broadcast %104 : vector<8x1xi32> to vector<8x128xi32>
    %106 = arith.cmpi eq, %9, %105 : vector<8x128xi32>
    %107 = arith.extui %106 : vector<8x128xi1> to vector<8x128xi32>
    %108 = arith.sitofp %107 : vector<8x128xi32> to vector<8x128xf32>
    %109 = arith.addf %93, %108 : vector<8x128xf32>
    %cst_27 = arith.constant 0.000000e+00 : f32
    %cst_28 = arith.constant 1.000000e+00 : f32
    %110 = vector.broadcast %cst_27 : f32 to vector<8x1xf32>
    %111 = vector.broadcast %cst_28 : f32 to vector<8x1xf32>
    %112 = arith.select %100, %110, %111 : vector<8x1xi1>, vector<8x1xf32>
    %113 = arith.addf %97, %112 : vector<8x1xf32>
    %114 = vector.extract_strided_slice %0 {offsets = [0, 8], sizes = [8, 1], strides = [1, 1]} : vector<8x16xi32> to vector<8x1xi32>
    %c0_i32_29 = arith.constant 0 : i32
    %115 = vector.broadcast %c0_i32_29 : i32 to vector<8x1xi32>
    %116 = arith.cmpi eq, %114, %115 : vector<8x1xi32>
    %c56_i32_30 = arith.constant 56 : i32
    %117 = vector.broadcast %c56_i32_30 : i32 to vector<8x1xi32>
    %118 = arith.addi %114, %117 : vector<8x1xi32>
    %c127_i32_31 = arith.constant 127 : i32
    %119 = vector.broadcast %c127_i32_31 : i32 to vector<8x1xi32>
    %120 = arith.select %116, %119, %118 : vector<8x1xi1>, vector<8x1xi32>
    %121 = vector.broadcast %120 : vector<8x1xi32> to vector<8x128xi32>
    %122 = arith.cmpi eq, %9, %121 : vector<8x128xi32>
    %123 = arith.extui %122 : vector<8x128xi1> to vector<8x128xi32>
    %124 = arith.sitofp %123 : vector<8x128xi32> to vector<8x128xf32>
    %125 = arith.addf %109, %124 : vector<8x128xf32>
    %cst_32 = arith.constant 0.000000e+00 : f32
    %cst_33 = arith.constant 1.000000e+00 : f32
    %126 = vector.broadcast %cst_32 : f32 to vector<8x1xf32>
    %127 = vector.broadcast %cst_33 : f32 to vector<8x1xf32>
    %128 = arith.select %116, %126, %127 : vector<8x1xi1>, vector<8x1xf32>
    %129 = arith.addf %113, %128 : vector<8x1xf32>
    %130 = vector.extract_strided_slice %0 {offsets = [0, 9], sizes = [8, 1], strides = [1, 1]} : vector<8x16xi32> to vector<8x1xi32>
    %c0_i32_34 = arith.constant 0 : i32
    %131 = vector.broadcast %c0_i32_34 : i32 to vector<8x1xi32>
    %132 = arith.cmpi eq, %130, %131 : vector<8x1xi32>
    %c56_i32_35 = arith.constant 56 : i32
    %133 = vector.broadcast %c56_i32_35 : i32 to vector<8x1xi32>
    %134 = arith.addi %130, %133 : vector<8x1xi32>
    %c127_i32_36 = arith.constant 127 : i32
    %135 = vector.broadcast %c127_i32_36 : i32 to vector<8x1xi32>
    %136 = arith.select %132, %135, %134 : vector<8x1xi1>, vector<8x1xi32>
    %137 = vector.broadcast %136 : vector<8x1xi32> to vector<8x128xi32>
    %138 = arith.cmpi eq, %9, %137 : vector<8x128xi32>
    %139 = arith.extui %138 : vector<8x128xi1> to vector<8x128xi32>
    %140 = arith.sitofp %139 : vector<8x128xi32> to vector<8x128xf32>
    %141 = arith.addf %125, %140 : vector<8x128xf32>
    %cst_37 = arith.constant 0.000000e+00 : f32
    %cst_38 = arith.constant 1.000000e+00 : f32
    %142 = vector.broadcast %cst_37 : f32 to vector<8x1xf32>
    %143 = vector.broadcast %cst_38 : f32 to vector<8x1xf32>
    %144 = arith.select %132, %142, %143 : vector<8x1xi1>, vector<8x1xf32>
    %145 = arith.addf %129, %144 : vector<8x1xf32>
    %c0_39 = arith.constant 0 : index
    %c0_40 = arith.constant 0 : index
    %146 = vector.load %arg2[%c0_39, %c0_40] : memref<128x64xf32, #tpu.memory_space<vmem>>, vector<128x64xf32>
    %cst_41 = arith.constant dense<0.000000e+00> : vector<8x64xf32>
    %147 = tpu.matmul %141, %146, %cst_41 {dimension_numbers = #tpu.dot_dimension_numbers<[1], [0], [0], [1], [0, 0, 1, 1], [], []>, precision = #tpu.contract_precision<fp32>} : vector<8x128xf32>, vector<128x64xf32>, vector<8x64xf32> -> vector<8x64xf32>
    %148 = tpu.iota {dimensions = array<i32: 1>} : vector<1x64xi32>
    %c32_i32_42 = arith.constant 32 : i32
    %149 = vector.broadcast %c32_i32_42 : i32 to vector<1x64xi32>
    %150 = arith.cmpi sge, %148, %149 : vector<1x64xi32>
    %c48_i32 = arith.constant 48 : i32
    %151 = vector.broadcast %c48_i32 : i32 to vector<1x64xi32>
    %152 = arith.cmpi slt, %148, %151 : vector<1x64xi32>
    %153 = arith.andi %150, %152 : vector<1x64xi1>
    %c48_i32_43 = arith.constant 48 : i32
    %154 = vector.broadcast %c48_i32_43 : i32 to vector<1x64xi32>
    %155 = arith.cmpi eq, %148, %154 : vector<1x64xi32>
    %156 = arith.extui %155 : vector<1x64xi1> to vector<1x64xi32>
    %157 = arith.sitofp %156 : vector<1x64xi32> to vector<1x64xf32>
    %cst_44 = arith.constant 1.000000e-16 : f32
    %158 = vector.broadcast %cst_44 : f32 to vector<8x1xf32>
    %159 = arith.addf %145, %158 : vector<8x1xf32>
    %160 = tpu.reciprocal %159 : vector<8x1xf32> -> vector<8x1xf32>
    %cst_45 = arith.constant 1.000000e+00 : f32
    %161 = vector.shape_cast %153 : vector<1x64xi1> to vector<1x64xi1>
    %162 = vector.broadcast %161 : vector<1x64xi1> to vector<8x64xi1>
    %163 = vector.shape_cast %160 : vector<8x1xf32> to vector<8x1xf32>
    %164 = vector.broadcast %163 : vector<8x1xf32> to vector<8x64xf32>
    %165 = vector.broadcast %cst_45 : f32 to vector<8x64xf32>
    %166 = arith.select %162, %164, %165 : vector<8x64xi1>, vector<8x64xf32>
    %167 = arith.mulf %147, %166 : vector<8x64xf32>
    %168 = vector.broadcast %8 : vector<8x1xf32> to vector<8x64xf32>
    %169 = vector.broadcast %157 : vector<1x64xf32> to vector<8x64xf32>
    %170 = arith.mulf %168, %169 : vector<8x64xf32>
    %171 = arith.addf %167, %170 : vector<8x64xf32>
    %c0_46 = arith.constant 0 : index
    %c0_47 = arith.constant 0 : index
    %172 = vector.load %arg3[%c0_46, %c0_47] : memref<8x64xf32, #tpu.memory_space<vmem>>, vector<8x64xf32>
    tpu.vector_store %arg3[%c0_46, %c0_47], %171 {strides = array<i32>} : memref<8x64xf32, #tpu.memory_space<vmem>>, vector<8x64xf32>,
    return
  }
  func.func @transform_0(%arg0: i32) -> (i32, i32) {
    %c0_i32 = arith.constant 0 : i32
    %c0_i32_0 = arith.constant 0 : i32
    return %arg0, %c0_i32 : i32, i32
  }
  func.func @transform_1(%arg0: i32) -> (i32, i32) {
    %c0_i32 = arith.constant 0 : i32
    %c0_i32_0 = arith.constant 0 : i32
    %c0_i32_1 = arith.constant 0 : i32
    return %c0_i32, %c0_i32_0 : i32, i32
  }
  func.func @transform_2(%arg0: i32) -> (i32, i32) {
    %c0_i32 = arith.constant 0 : i32
    %c0_i32_0 = arith.constant 0 : i32
    return %arg0, %c0_i32 : i32, i32
  }
}

</mosaic_0001>

<bundles_post_ra>
// kernel: embedding_layer_forward.1
= control target key start
LH: loop header
LB: loop body
LE: loop exit
PB: predicated region body
PF: predicated region fallthrough
CT: control target
= control target key end

     0   :  { %v1194_v1 = vmov 0   ;;  %v1195_v3 = vmov 2   ;;  %v1196_v16 = vmov 0.0   ;;  %s1708_s0 = inlined_call_operand.vmem [shape: s32[8,16], index: 0, kind: input, shape index: {}]   ;;  %s1709_s1 = inlined_call_operand.vmem [shape: f32[128,64], index: 1, kind: input, shape index: {}]   ;;  %s1710_s2 = inlined_call_operand.hbm [shape: f32[8,64], index: 2, kind: output, shape index: {}]  }
   0x1   :  { %v1234_v0 = vld [vmem:[%s1708_s0] sm:$0xff]  ;;  %1157 = vset.pattern.permute.xlu0 %v1194_v1  ;;  %1159 = vset.pattern.permute.xlu1 %v1195_v3  ;;  %v132_v4 = vld [vmem:[%s1709_s1 + $0x78] sm:$0xff]  ;;  %v131_v5 = vld [vmem:[%s1709_s1 + $0x70] sm:$0xff] }
   0x2   :  { %vm27_vm0 = vcmp.eq.s32.totalorder %v1234_v0, 0  ;;  %v28_v2 = vadd.s32 56, %v1234_v0  ;;  %17 = vperm.xlu0 %1157, %v1234_v0   ;;  %v130_v6 = vld [vmem:[%s1709_s1 + $0x68] sm:$0xff]  ;;  %v129_v7 = vld [vmem:[%s1709_s1 + $0x60] sm:$0xff]  ;;  %v128_v8 = vld [vmem:[%s1709_s1 + $0x58] sm:$0xff]  ;;  %v13_v10 = vadd.s32 32, %v1234_v0  ;;  %960 = vmatprep.subr.mxu1 %v1196_v16 }
   0x3   :  { %v127_v11 = vld [vmem:[%s1709_s1 + $0x50] sm:$0xff]  ;;  %v126_v12 = vld [vmem:[%s1709_s1 + $0x48] sm:$0xff]  ;;  %v1267_v13 = vand.u32 4294901760, %v132_v4  ;;  %v1269_v14 = vand.u32 4294901760, %v131_v5  ;;  %v125_v15 = vld [vmem:[%s1709_s1 + $0x40] sm:$0xff]  ;;  %v1275_v17 = vand.u32 4294901760, %v130_v6  ;;  %925 = vmatprep.subr.mxu0 %v1196_v16 }
   0x4   :  { %v1257_v9 = vsel %vm27_vm0, 127, %v28_v2  ;;  %v1277_v18 = vand.u32 4294901760, %v129_v7  ;;  %v1280_v19 = vand.u32 4294901760, %v128_v8  ;;  %v1282_v20 = vand.u32 4294901760, %v127_v11 }
   0x5   :  { %31 = vperm.xlu1 %1159, %v1257_v9  }
   0x6   :  { %7 = vsyncpa [#allocation3], 0  ;;  %v1197_v21 = vmov 1   ;;  %v1285_v22 = vsub.f32 %v132_v4, %v1267_v13  ;;  %v1288_v23 = vsub.f32 %v131_v5, %v1269_v14  ;;  %926 = vmatpush3.msra.mxu0 %v1267_v13  ;;  %v1291_v24 = vand.u32 4294901760, %v126_v12  ;;  %v124_v43 = vld [vmem:[%s1709_s1 + $0x38] sm:$0xff]  ;;  %v123_v44 = vld [vmem:[%s1709_s1 + $0x30] sm:$0xff] }
   0x7   :  { %1158 = vset.pattern.permute.xlu0 %v1197_v21  ;;  %v1294_v25 = vsub.f32 %v130_v6, %v1275_v17  ;;  %v1297_v26 = vsub.f32 %v129_v7, %v1277_v18  ;;  %v1300_v27 = vsub.f32 %v128_v8, %v1280_v19  ;;  %927 = vmatprep.subr.mxu0 %v1196_v16  ;;  %v1303_v28 = vand.u32 4294901760, %v125_v15  ;;  %v122_v48 = vld [vmem:[%s1709_s1 + $0x28] sm:$0xff]  ;;  %v121_v51 = vld [vmem:[%s1709_s1 + $0x20] sm:$0xff]  ;;  %v120_v59 = vld [vmem:[%s1709_s1 + $0x18] sm:$0xff]  ;;  %s1208_s14 = smov 126   ;;  %s1209_s0 = smov 125  }
   0x8   :  { %21 = vperm.xlu0 %1158, %v13_v10   ;;  %v1198_v29 = vmov 3   ;;  %v227_v30 = vand.u32 4294901760, %v1285_v22  ;;  %v234_v31 = vand.u32 4294901760, %v1288_v23  ;;  %928 = vmatpush3.msra.mxu0 %v1269_v14  ;;  %v1309_v32 = vsub.f32 %v127_v11, %v1282_v20  ;;  %v119_v4 = vld [vmem:[%s1709_s1 + $0x10] sm:$0xff]  ;;  %s1210_s15 = smov 124   ;;  %s1211_s16 = smov 123  }
   0x9   :  { %1160 = vset.pattern.permute.xlu1 %v1198_v29  ;;  %v241_v33 = vand.u32 4294901760, %v1294_v25  ;;  %v248_v34 = vand.u32 4294901760, %v1297_v26  ;;  %929 = vmatprep.subr.mxu0 %v1196_v16  ;;  %v1316_v35 = vsub.f32 %v126_v12, %v1291_v24  ;;  %v255_v38 = vand.u32 4294901760, %v1300_v27  ;;  %v118_v12 = vld [vmem:[%s1709_s1 + $0x8] sm:$0xff]  ;;  %s1212_s17 = smov 122   ;;  %s1213_s18 = smov 121  }
   0xa   :  { %40 = vperm.xlu1 %1160, %v1257_v9   ;;  %v228_v36 = vsub.f32 %v1285_v22, %v227_v30  ;;  %v235_v37 = vsub.f32 %v1288_v23, %v234_v31  ;;  %930 = vmatpush3.msra.mxu0 %v1275_v17  ;;  %v1199_v39 = vmov 5   ;;  %v262_v41 = vand.u32 4294901760, %v1309_v32  ;;  %s1215_s19 = smov [#allocation2]  }
   0xb   :  { %v242_v40 = vsub.f32 %v1294_v25, %v241_v33  ;;  %931 = vmatprep.subr.mxu0 %v1196_v16  ;;  %v1332_v42 = vsub.f32 %v125_v15, %v1303_v28  ;;  %v249_v47 = vsub.f32 %v1297_v26, %v248_v34  ;;  %v1200_v49 = vmov 4   ;;  %s805_s20 = sshll.u32 %s1215_s19, 4  ;;  %s806_s20 = int_to_ptr.vmem [resolvable:$true] %s805_s20 }
   0xc   :  { %1162 = vset.pattern.permute.xlu0 %v1199_v39  ;;  %v229_v45 = vand.u32 4294901760, %v228_v36  ;;  %v236_v46 = vand.u32 4294901760, %v235_v37  ;;  %932 = vmatpush3.msra.mxu0 %v1277_v18  ;;  %v269_v50 = vand.u32 4294901760, %v1316_v35  ;;  %v256_v53 = vsub.f32 %v1300_v27, %v255_v38  ;;  %v117_v39 = vld [vmem:[%s1709_s1] sm:$0xff]  ;;  %s1206_s1 = smov 127   ;;  %s1172_s21 = scalar_lea.vmem %s806_s20, 128 }
   0xd   :  { %63 = vperm.xlu0 %1162, %v1257_v9   ;;  %933 = vmatprep.subr.mxu0 %v1196_v16  ;;  %v243_v52 = vand.u32 4294901760, %v242_v40  ;;  %v1357_v54 = vand.u32 4294901760, %v124_v43  ;;  %v1359_v55 = vand.u32 4294901760, %v123_v44  ;;  %v263_v56 = vsub.f32 %v1309_v32, %v262_v41  ;;  %p1173_p0 = scmp.ne.s32.totalorder %s806_s20, %s1172_s21  ;;  %p1177_p1 = scmp.lt.s32.totalorder %s806_s20, %s806_s20 }
   0xe   :  { %1161 = vset.pattern.permute.xlu1 %v1200_v49  ;;  %961 = vmatpush3.msra.mxu1 %v229_v45  ;;  %v276_v57 = vand.u32 4294901760, %v1332_v42  ;;  %v1367_v58 = vand.u32 4294901760, %v122_v48  ;;  %v1201_v60 = vmov 8   ;;  %v250_v61 = vand.u32 4294901760, %v249_v47  ;;  %p1178_p2 = scmp.lt.s32.totalorder %s1172_s21, %s1172_s21 }
   0xf   :  { %52 = vperm.xlu1 %1161, %v1257_v9   ;;  %962 = vmatprep.subr.mxu1 %v1196_v16  ;;  %v1373_v62 = vsub.f32 %v124_v43, %v1357_v54  ;;  %v1376_v63 = vsub.f32 %v123_v44, %v1359_v55  ;;  %v1378_v1 = vand.u32 4294901760, %v121_v51  ;;  %v270_v2 = vsub.f32 %v1316_v35, %v269_v50 }
  0x10   :  { %934 = vmatpush3.msra.mxu0 %v1280_v19  ;;  %963 = vmatpush3.msra.mxu1 %v236_v46  ;;  %v1202_v5 = vmov 6   ;;  %v257_v6 = vand.u32 4294901760, %v256_v53  ;;  %v1390_v8 = vsub.f32 %v122_v48, %v1367_v58  ;;  %v1392_v10 = vand.u32 4294901760, %v120_v59  ;;  %p1179_p3 = por %p1178_p2, %p1177_p1 }
  0x11   :  { %1165 = vset.pattern.permute.xlu0 %v1201_v60  ;;  %964 = vmatprep.subr.mxu1 %v1196_v16  ;;  %v283_v7 = vand.u32 4294901760, %v1373_v62  ;;  %v277_v11 = vsub.f32 %v1332_v42, %v276_v57  ;;  %v264_v15 = vand.u32 4294901760, %v263_v56  ;;  %v290_v21 = vand.u32 4294901760, %v1376_v63 }
  0x12   :  { %96 = vperm.xlu0 %1165, %v1257_v9   ;;  %965 = vmatpush3.msra.mxu1 %v243_v52  ;;  %v1405_v29 = vsub.f32 %v121_v51, %v1378_v1  ;;  %v1407_v36 = vand.u32 4294901760, %v119_v4  ;;  %v271_v37 = vand.u32 4294901760, %v270_v2  ;;  %v297_v43 = vand.u32 4294901760, %v1390_v8  ;;  %p1180_p4 = pnand %p1179_p3, %p1173_p0 }
  0x13   :  { %1163 = vset.pattern.permute.xlu1 %v1202_v5  ;;  %966 = vmatprep.subr.mxu1 %v1196_v16  ;;  %v284_v40 = vsub.f32 %v1373_v62, %v283_v7  ;;  %v1420_v44 = vsub.f32 %v120_v59, %v1392_v10  ;;  %v1422_v45 = vand.u32 4294901760, %v118_v12  ;;  %v1203_v46 = vmov 7  }
  0x14   :  { %74 = vperm.xlu1 %1163, %v1257_v9   ;;  %967 = vmatpush3.msra.mxu1 %v250_v61  ;;  %v278_v47 = vand.u32 4294901760, %v277_v11  ;;  %v291_v48 = vsub.f32 %v1376_v63, %v290_v21  ;;  %v304_v49 = vand.u32 4294901760, %v1405_v29  ;;  %v1431_v51 = vsub.f32 %v119_v4, %v1407_v36 }
  0x15   :  { %935 = vmatprep.subr.mxu0 %v1196_v16  ;;  %968 = vmatprep.subr.mxu1 %v1196_v16  ;;  %v1433_v52 = vand.u32 4294901760, %v117_v39  ;;  %v285_v53 = vand.u32 4294901760, %v284_v40  ;;  %v298_v56 = vsub.f32 %v1390_v8, %v297_v43  ;;  %v311_v59 = vand.u32 4294901760, %v1420_v44 }
  0x16   :  { %936 = vmatpush3.msra.mxu0 %v1282_v20  ;;  %969 = vmatpush3.msra.mxu1 %v257_v6  ;;  %v1443_v60 = vsub.f32 %v118_v12, %v1422_v45  ;;  %v1204_v61 = vmov 9   ;;  %v292_v2 = vand.u32 4294901760, %v291_v48  ;;  %v305_v4 = vsub.f32 %v1405_v29, %v304_v49 }
  0x17   :  { %937 = vmatprep.subr.mxu0 %v1196_v16  ;;  %970 = vmatprep.subr.mxu1 %v1196_v16  ;;  %v318_v5 = vand.u32 4294901760, %v1431_v51  ;;  %v1452_v6 = vsub.f32 %v117_v39, %v1433_v52  ;;  %v299_v11 = vand.u32 4294901760, %v298_v56  ;;  %v312_v12 = vsub.f32 %v1420_v44, %v311_v59 }
  0x18   :  { %1164 = vset.pattern.permute.xlu1 %v1203_v46  ;;  %971 = vmatpush3.msra.mxu1 %v264_v15  ;;  %v325_v15 = vand.u32 4294901760, %v1443_v60  ;;  %vm1207_vm1 = vmmov 0  }
  0x19   :  { %85 = vperm.xlu1 %1164, %v1257_v9   ;;  %972 = vmatprep.subr.mxu1 %v1196_v16  ;;  %v1711_v39 = vand.u32 4294901760, %v1452_v6  ;;  %v313_v40 = vand.u32 4294901760, %v312_v12 }
  0x1a   :  { %938 = vmatpush3.msra.mxu0 %v1291_v24  ;;  %973 = vmatpush3.msra.mxu1 %v271_v37  ;;  %v306_v37 = vand.u32 4294901760, %v305_v4  ;;  %v326_v46 = vsub.f32 %v1443_v60, %v325_v15  ;;  %v1214_v4 = vmov 10  }
  0x1b   :  { %939 = vmatprep.subr.mxu0 %v1196_v16  ;;  %974 = vmatprep.subr.mxu1 %v1196_v16  ;;  %v333_v56 = vsub.f32 %v1452_v6, %v1711_v39 }
  0x1c   :  { %940 = vmatpush3.msra.mxu0 %v1303_v28  ;;  %975 = vmatpush3.msra.mxu1 %v278_v47  ;;  %v1205_v47 = vmov 1.0  }
  0x1d   :  { %1166 = vset.pattern.permute.xlu1 %v1204_v61  ;;  %976 = vmatprep.subr.mxu1 %v1196_v16  ;;  %v1476_v48 = vsel %vm27_vm0, 0.0, %v1205_v47  ;;  %v327_v61 = vand.u32 4294901760, %v326_v46 }
  0x1e   :  { %107 = vperm.xlu1 %1166, %v1257_v9   ;;  %977 = vmatpush3.msra.mxu1 %v285_v53  ;;  %v319_v9 = vsub.f32 %v1431_v51, %v318_v5 }
  0x1f   :  { %941 = vmatprep.subr.mxu0 %v1196_v16  ;;  %978 = vmatprep.subr.mxu1 %v1196_v16 }
  0x20   :  { %942 = vmatpush3.msra.mxu0 %v1357_v54  ;;  %979 = vmatpush3.msra.mxu1 %v292_v2  ;;  %v320_v53 = vand.u32 4294901760, %v319_v9  ;;  %v334_v2 = vand.u32 4294901760, %v333_v56 }
  0x21   :  { %943 = vmatprep.subr.mxu0 %v1196_v16  ;;  %980 = vmatprep.subr.mxu1 %v1196_v16 }
  0x22   :  { %944 = vmatpush3.msra.mxu0 %v1359_v55  ;;  %981 = vmatpush3.msra.mxu1 %v299_v11  ;;  %v14_v11 = vlaneseq }
  0x23   :  { %945 = vmatprep.subr.mxu0 %v1196_v16  ;;  %982 = vmatprep.subr.mxu1 %v1196_v16 }
  0x24   :  { %946 = vmatpush3.msra.mxu0 %v1367_v58  ;;  %983 = vmatpush3.msra.mxu1 %v306_v37  ;;  %v1513_v12 = vand.u32 127, %v14_v11 }
  0x25   :  { %947 = vmatprep.subr.mxu0 %v1196_v16  ;;  %984 = vmatprep.subr.mxu1 %v1196_v16 }
  0x26   :  { %948 = vmatpush3.msra.mxu0 %v1378_v1  ;;  %985 = vmatpush3.msra.mxu1 %v313_v40  ;;  %vm774_vm13 = vcmp.ge.s32.totalorder %v1513_v12, 32  ;;  %vm775_vm14 = vcmp.lt.s32.totalorder %v1513_v12, 48  ;;  %vm777_vm15 = vcmp.eq.s32.totalorder %v1513_v12, 48 }
  0x27   :  { %47 = vrot.lane.b32.xlu1 %v1476_v48, %s1206_s1  ;;  %986 = vmatprep.subr.mxu1 %v1196_v16  ;;  %vm776_vm0 = vmand %vm774_vm13, %vm775_vm14 }
  0x28   :  { %949 = vmatprep.subr.mxu0 %v1196_v16  ;;  %987 = vmatpush3.msra.mxu1 %v320_v53 }
  0x29   :  { %992 = vmatprep.mubr.msk.f32.mxu1 %vm1207_vm1, %v1196_v16  ;;  %988 = vmatprep.subr.mxu1 %v1196_v16 }
  0x2a   :  { %950 = vmatpush3.msra.mxu0 %v1392_v10  ;;  %989 = vmatpush3.msra.mxu1 %v327_v61 }
  0x2b   :  { %58 = vrot.lane.b32.xlu0 %v1476_v48, %s1208_s14  ;;  %990 = vmatprep.subr.mxu1 %v1196_v16 }
  0x2c   :  { %951 = vmatprep.subr.mxu0 %v1196_v16  ;;  %991 = vmatpush3.msra.mxu1 %v334_v2 }
  0x2d   :  { %952 = vmatpush3.msra.mxu0 %v1407_v36  ;;  %1030 = vmatprep.subr.mxu1 %v1196_v16 }
  0x2e   :  { %69 = vrot.lane.b32.xlu1 %v1476_v48, %s1209_s0  ;;  %953 = vmatprep.subr.mxu0 %v1196_v16 }
  0x2f   :  { %80 = vrot.lane.b32.xlu0 %v1476_v48, %s1210_s15  ;;  %954 = vmatpush3.msra.mxu0 %v1422_v45 }
  0x30   :  { %957 = vmatprep.mubr.msk.f32.mxu0 %vm1207_vm1, %v1196_v16  ;;  %955 = vmatprep.subr.mxu0 %v1196_v16 }
  0x31   :  { %1167 = vset.pattern.permute.xlu0 %v1195_v3  ;;  %956 = vmatpush3.msra.mxu0 %v1433_v52 }
  0x32   :  { %91 = vrot.lane.b32.xlu1 %v1476_v48, %s1211_s16  ;;  %995 = vmatprep.subr.mxu0 %v1196_v16 }
  0x33   :  { %102 = vrot.lane.b32.xlu0 %v1476_v48, %s1212_s17  ;;  %1168 = vset.pattern.permute.xlu1 %v1214_v4 }
  0x36   :  { %113 = vrot.lane.b32.xlu1 %v1476_v48, %s1213_s18 }
  0x3a   :  { %792 = vperm.xlu1 %1168, %v1234_v0  }
  0x7d   :  { %v18_v3 = vpop.permute.xlu0 %17 }
  0x7e   :  { %vm19_vm2 = vcmp.eq.s32.totalorder %v1513_v12, %v18_v3 }
  0x80   :  { %v32_v37 = vpop.permute.xlu1 %31 }
  0x81   :  { %vm33_vm3 = vcmp.eq.s32.totalorder %v1513_v12, %v32_v37 }
  0x82   :  { %v814_v46 = vsel %vm33_vm3, 1.0, %v1196_v16 }
  0x83   :  { %v22_v9 = vpop.permute.xlu0 %21 }
  0x84   :  { %vm23_vm4 = vcmp.eq.s32.totalorder %v1513_v12, %v22_v9 }
  0x85   :  { %vm24_vm5 = vmor %vm19_vm2, %vm23_vm4  ;;  %v41_v40 = vpop.permute.xlu1 %40 }
  0x86   :  { %v813_v47 = vsel %vm24_vm5, 1.0, %v1196_v16  ;;  %vm42_vm6 = vcmp.eq.s32.totalorder %v1513_v12, %v41_v40 }
  0x87   :  { %v36_v0 = vadd.f32 %v814_v46, %v813_v47  ;;  %v815_v53 = vsel %vm42_vm6, 1.0, %v1196_v16 }
  0x88   :  { %v64_v56 = vpop.permute.xlu0 %63 }
  0x89   :  { %v45_v2 = vadd.f32 %v815_v53, %v36_v0  ;;  %vm65_vm8 = vcmp.eq.s32.totalorder %v1513_v12, %v64_v56 }
  0x8a   :  { %v53_v61 = vpop.permute.xlu1 %52  ;;  %v817_v37 = vsel %vm65_vm8, 1.0, %v1196_v16 }
  0x8b   :  { %vm54_vm7 = vcmp.eq.s32.totalorder %v1513_v12, %v53_v61 }
  0x8c   :  { %v816_v11 = vsel %vm54_vm7, 1.0, %v1196_v16 }
  0x8d   :  { %v57_v3 = vadd.f32 %v816_v11, %v45_v2  ;;  %v97_v39 = vpop.permute.xlu0 %96 }
  0x8e   :  { %vm98_vm10 = vcmp.eq.s32.totalorder %v1513_v12, %v97_v39 }
  0x8f   :  { %v75_v9 = vpop.permute.xlu1 %74  ;;  %v68_v40 = vadd.f32 %v817_v37, %v57_v3  ;;  %v820_v56 = vsel %vm98_vm10, 1.0, %v1196_v16 }
  0x90   :  { %vm76_vm9 = vcmp.eq.s32.totalorder %v1513_v12, %v75_v9 }
  0x91   :  { %v818_v46 = vsel %vm76_vm9, 1.0, %v1196_v16 }
  0x92   :  { %v79_v0 = vadd.f32 %v818_v46, %v68_v40 }
  0x94   :  { %v86_v47 = vpop.permute.xlu1 %85 }
  0x95   :  { %vm87_vm11 = vcmp.eq.s32.totalorder %v1513_v12, %v86_v47 }
  0x96   :  { %v819_v53 = vsel %vm87_vm11, 1.0, %v1196_v16 }
  0x97   :  { %v90_v61 = vadd.f32 %v819_v53, %v79_v0 }
  0x99   :  { %v101_v2 = vadd.f32 %v820_v56, %v90_v61  ;;  %v108_v11 = vpop.permute.xlu1 %107 }
  0x9a   :  { %vm109_vm12 = vcmp.eq.s32.totalorder %v1513_v12, %v108_v11 }
  0x9b   :  { %v821_v9 = vsel %vm109_vm12, 1.0, %v1196_v16 }
  0x9c   :  { %v112_v3 = vadd.f32 %v821_v9, %v101_v2 }
  0x9d   :  { %v48_v0 = vpop.permute.xlu1 %47  ;;  %v59_v56 = vpop.permute.xlu0 %58 }
  0x9e   :  { %v1534_v37 = vand.u32 4294901760, %v112_v3  ;;  %v50_v53 = vadd.f32 %v48_v0, %v1476_v48 }
  0xa0   :  { %v1537_v39 = vsub.f32 %v112_v3, %v1534_v37  ;;  %993 = vmatmul.mubr.f32.vlgmr.msra.gmra.mxu1 %v1534_v37  ;;  %v61_v61 = vadd.f32 %v59_v56, %v50_v53 }
  0xa1   :  { %1031 = vmatpush3.msra.mxu1 %v1267_v13  ;;  %1062 = vmatprep.mubr.msk.f32.mxu1 %vm1207_vm1, %v1196_v16  ;;  %v70_v48 = vpop.permute.xlu1 %69  ;;  %v81_v11 = vpop.permute.xlu0 %80 }
  0xa2   :  { %1032 = vmatprep.subr.mxu1 %v1196_v16  ;;  %v216_v40 = vand.u32 4294901760, %v1537_v39  ;;  %v72_v2 = vadd.f32 %v70_v48, %v61_v61 }
  0xa3   :  { %1033 = vmatpush3.msra.mxu1 %v1269_v14 }
  0xa4   :  { %1034 = vmatprep.subr.mxu1 %v1196_v16  ;;  %v217_v46 = vsub.f32 %v1537_v39, %v216_v40  ;;  %v83_v9 = vadd.f32 %v81_v11, %v72_v2 }
  0xa5   :  { %1035 = vmatpush3.msra.mxu1 %v1275_v17  ;;  %v92_v3 = vpop.permute.xlu1 %91 }
  0xa6   :  { %1036 = vmatprep.subr.mxu1 %v1196_v16  ;;  %v218_v47 = vand.u32 4294901760, %v217_v46  ;;  %v94_v46 = vadd.f32 %v92_v3, %v83_v9 }
  0xa7   :  { %1037 = vmatpush3.msra.mxu1 %v1277_v18 }
  0xa8   :  { %1038 = vmatprep.subr.mxu1 %v1196_v16  ;;  %958 = vmatmul.mubr.f32.vlgmr.msra.gmra.mxu0 %v218_v47 }
  0xa9   :  { %996 = vmatpush3.msra.mxu0 %v1285_v22  ;;  %1039 = vmatpush3.msra.mxu1 %v1280_v19 }
  0xaa   :  { %997 = vmatprep.subr.mxu0 %v1196_v16  ;;  %1040 = vmatprep.subr.mxu1 %v1196_v16 }
  0xab   :  { %998 = vmatpush3.msra.mxu0 %v1288_v23  ;;  %1041 = vmatpush3.msra.mxu1 %v1282_v20 }
  0xac   :  { %999 = vmatprep.subr.mxu0 %v1196_v16  ;;  %1042 = vmatprep.subr.mxu1 %v1196_v16 }
  0xad   :  { %1000 = vmatpush3.msra.mxu0 %v1294_v25  ;;  %1043 = vmatpush3.msra.mxu1 %v1291_v24 }
  0xae   :  { %1001 = vmatprep.subr.mxu0 %v1196_v16  ;;  %1044 = vmatprep.subr.mxu1 %v1196_v16 }
  0xaf   :  { %1002 = vmatpush3.msra.mxu0 %v1297_v26  ;;  %1045 = vmatpush3.msra.mxu1 %v1303_v28 }
  0xb0   :  { %1003 = vmatprep.subr.mxu0 %v1196_v16  ;;  %1046 = vmatprep.subr.mxu1 %v1196_v16 }
  0xb1   :  { %1004 = vmatpush3.msra.mxu0 %v1300_v27  ;;  %1047 = vmatpush3.msra.mxu1 %v1357_v54 }
  0xb2   :  { %1005 = vmatprep.subr.mxu0 %v1196_v16  ;;  %1048 = vmatprep.subr.mxu1 %v1196_v16 }
  0xb3   :  { %1006 = vmatpush3.msra.mxu0 %v1309_v32  ;;  %1049 = vmatpush3.msra.mxu1 %v1359_v55 }
  0xb4   :  { %1007 = vmatprep.subr.mxu0 %v1196_v16  ;;  %1050 = vmatprep.subr.mxu1 %v1196_v16 }
  0xb5   :  { %1008 = vmatpush3.msra.mxu0 %v1316_v35  ;;  %1051 = vmatpush3.msra.mxu1 %v1367_v58 }
  0xb6   :  { %1009 = vmatprep.subr.mxu0 %v1196_v16  ;;  %1052 = vmatprep.subr.mxu1 %v1196_v16 }
  0xb7   :  { %1010 = vmatpush3.msra.mxu0 %v1332_v42  ;;  %1053 = vmatpush3.msra.mxu1 %v1378_v1  ;;  %v822_v42 = vsel %vm777_vm15, 1.0, %v1196_v16 }
  0xb8   :  { %1011 = vmatprep.subr.mxu0 %v1196_v16  ;;  %1054 = vmatprep.subr.mxu1 %v1196_v16 }
  0xb9   :  { %1012 = vmatpush3.msra.mxu0 %v1373_v62  ;;  %1055 = vmatpush3.msra.mxu1 %v1392_v10 }
  0xba   :  { %1013 = vmatprep.subr.mxu0 %v1196_v16  ;;  %1056 = vmatprep.subr.mxu1 %v1196_v16 }
  0xbb   :  { %1014 = vmatpush3.msra.mxu0 %v1376_v63  ;;  %1057 = vmatpush3.msra.mxu1 %v1407_v36 }
  0xbc   :  { %1015 = vmatprep.subr.mxu0 %v1196_v16  ;;  %1058 = vmatprep.subr.mxu1 %v1196_v16 }
  0xbd   :  { %1016 = vmatpush3.msra.mxu0 %v1390_v8  ;;  %1059 = vmatpush3.msra.mxu1 %v1422_v45 }
  0xbe   :  { %1017 = vmatprep.subr.mxu0 %v1196_v16  ;;  %1060 = vmatprep.subr.mxu1 %v1196_v16 }
  0xbf   :  { %1018 = vmatpush3.msra.mxu0 %v1405_v29  ;;  %1061 = vmatpush3.msra.mxu1 %v1433_v52 }
  0xc0   :  { %1019 = vmatprep.subr.mxu0 %v1196_v16  ;;  %1063 = vmatmul.mubr.f32.vlgmr.msra.gmra.mxu1 %v216_v40  ;;  %v103_v40 = vpop.permute.xlu0 %102 }
  0xc1   :  { %1100 = vmatprep.subr.mxu1 %v1196_v16  ;;  %1020 = vmatpush3.msra.mxu0 %v1420_v44 }
  0xc2   :  { %1101 = vmatpush3.msra.mxu1 %v1267_v13  ;;  %1021 = vmatprep.subr.mxu0 %v1196_v16  ;;  %v105_v13 = vadd.f32 %v103_v40, %v94_v46 }
  0xc3   :  { %1102 = vmatprep.subr.mxu1 %v1196_v16  ;;  %1022 = vmatpush3.msra.mxu0 %v1431_v51 }
  0xc4   :  { %1103 = vmatpush3.msra.mxu1 %v1269_v14  ;;  %1023 = vmatprep.subr.mxu0 %v1196_v16  ;;  %v114_v14 = vpop.permute.xlu1 %113 }
  0xc5   :  { %1104 = vmatprep.subr.mxu1 %v1196_v16  ;;  %1024 = vmatpush3.msra.mxu0 %v1443_v60 }
  0xc6   :  { %1105 = vmatpush3.msra.mxu1 %v1275_v17  ;;  %1025 = vmatprep.subr.mxu0 %v1196_v16  ;;  %v116_v17 = vadd.f32 %v114_v14, %v105_v13 }
  0xc7   :  { %1106 = vmatprep.subr.mxu1 %v1196_v16  ;;  %1026 = vmatpush3.msra.mxu0 %v1452_v6 }
  0xc8   :  { %1027 = vmatprep.mubr.msk.f32.mxu0 %vm1207_vm1, %v1196_v16  ;;  %1107 = vmatpush3.msra.mxu1 %v1277_v18  ;;  %v780_v18 = vadd.f32 1e-16, %v116_v17 }
  0xc9   :  { %1028 = vmatmul.mubr.f32.vlgmr.msra.gmra.mxu0 %v1537_v39  ;;  %1065 = vmatprep.subr.mxu0 %v1196_v16 }
  0xca   :  { %1108 = vmatprep.subr.mxu1 %v1196_v16  ;;  %1066 = vmatpush3.msra.mxu0 %v227_v30  ;;  %1170 = vrcp.f32 %v780_v18 }
  0xcb   :  { %1109 = vmatpush3.msra.mxu1 %v1280_v19  ;;  %1067 = vmatprep.subr.mxu0 %v1196_v16 }
  0xcc   :  { %1110 = vmatprep.subr.mxu1 %v1196_v16  ;;  %1068 = vmatpush3.msra.mxu0 %v234_v31 }
  0xcd   :  { %1111 = vmatpush3.msra.mxu1 %v1282_v20  ;;  %1069 = vmatprep.subr.mxu0 %v1196_v16  ;;  %v1712_v20 = vand.u32 4294901760, %v1452_v6 }
  0xce   :  { %1112 = vmatprep.subr.mxu1 %v1196_v16  ;;  %1070 = vmatpush3.msra.mxu0 %v241_v33 }
  0xcf   :  { %1113 = vmatpush3.msra.mxu1 %v1291_v24  ;;  %1071 = vmatprep.subr.mxu0 %v1196_v16 }
  0xd0   :  { %1114 = vmatprep.subr.mxu1 %v1196_v16  ;;  %1072 = vmatpush3.msra.mxu0 %v248_v34 }
  0xd1   :  { %1115 = vmatpush3.msra.mxu1 %v1303_v28  ;;  %1073 = vmatprep.subr.mxu0 %v1196_v16 }
  0xd2   :  { %1116 = vmatprep.subr.mxu1 %v1196_v16  ;;  %1074 = vmatpush3.msra.mxu0 %v255_v38 }
  0xd3   :  { %1117 = vmatpush3.msra.mxu1 %v1357_v54  ;;  %1075 = vmatprep.subr.mxu0 %v1196_v16 }
  0xd4   :  { %1118 = vmatprep.subr.mxu1 %v1196_v16  ;;  %1076 = vmatpush3.msra.mxu0 %v262_v41 }
  0xd5   :  { %1119 = vmatpush3.msra.mxu1 %v1359_v55  ;;  %1077 = vmatprep.subr.mxu0 %v1196_v16 }
  0xd6   :  { %1120 = vmatprep.subr.mxu1 %v1196_v16  ;;  %1078 = vmatpush3.msra.mxu0 %v269_v50  ;;  %v793_v50 = vpop.permute.xlu1 %792 }
  0xd7   :  { %1121 = vmatpush3.msra.mxu1 %v1367_v58  ;;  %1079 = vmatprep.subr.mxu0 %v1196_v16  ;;  %v1171_v19 = vpop.eup %1170  ;;  %v795_v62 = vmul.f32 %v822_v42, %v793_v50 }
  0xd8   :  { %1122 = vmatprep.subr.mxu1 %v1196_v16  ;;  %1080 = vmatpush3.msra.mxu0 %v276_v57 }
  0xd9   :  { %1123 = vmatpush3.msra.mxu1 %v1378_v1  ;;  %1081 = vmatprep.subr.mxu0 %v1196_v16 }
  0xda   :  { %1124 = vmatprep.subr.mxu1 %v1196_v16  ;;  %1082 = vmatpush3.msra.mxu0 %v283_v7 }
  0xdb   :  { %1125 = vmatpush3.msra.mxu1 %v1392_v10  ;;  %1083 = vmatprep.subr.mxu0 %v1196_v16 }
  0xdc   :  { %1126 = vmatprep.subr.mxu1 %v1196_v16  ;;  %1084 = vmatpush3.msra.mxu0 %v290_v21 }
  0xdd   :  { %1127 = vmatpush3.msra.mxu1 %v1407_v36  ;;  %1085 = vmatprep.subr.mxu0 %v1196_v16 }
  0xde   :  { %1128 = vmatprep.subr.mxu1 %v1196_v16  ;;  %1086 = vmatpush3.msra.mxu0 %v297_v43 }
  0xdf   :  { %1129 = vmatpush3.msra.mxu1 %v1422_v45  ;;  %1087 = vmatprep.subr.mxu0 %v1196_v16 }
  0xe0   :  { %1130 = vmatprep.subr.mxu1 %v1196_v16  ;;  %1088 = vmatpush3.msra.mxu0 %v304_v49 }
  0xe1   :  { %1131 = vmatpush3.msra.mxu1 %v1433_v52  ;;  %1132 = vmatprep.mubr.msk.f32.mxu1 %vm1207_vm1, %v1196_v16 }
  0xe2   :  { %1089 = vmatprep.subr.mxu0 %v1196_v16  ;;  %1133 = vmatmul.mubr.f32.vlgmr.msra.gmra.mxu1 %v1534_v37 }
  0xe3   :  { %1090 = vmatpush3.msra.mxu0 %v311_v59  ;;  %1097 = vmatprep.mubr.msk.f32.mxu0 %vm1207_vm1, %v1196_v16  ;;  %vm797_vm1 = vcmask 523264  }
  0xe4   :  { %1091 = vmatprep.subr.mxu0 %v1196_v16  ;;  %786 = vperm.xlu0 %1167, %v1171_v19  }
  0xe5   :  { %1092 = vmatpush3.msra.mxu0 %v318_v5 }
  0xe6   :  { %1093 = vmatprep.subr.mxu0 %v1196_v16 }
  0xe7   :  { %1094 = vmatpush3.msra.mxu0 %v325_v15 }
  0xe8   :  { %1095 = vmatprep.subr.mxu0 %v1196_v16  ;;  %1169 = vset.pattern.permute.xlu0 %v1214_v4 }
  0xe9   :  { %1096 = vmatpush3.msra.mxu0 %v1712_v20 }
  0xea   :  { %1098 = vmatmul.mubr.f32.vlgmr.msra.gmra.mxu0 %v1534_v37 }
 0x15f   :  { %v787_v38 = vpop.permute.xlu0 %786 }
 0x160   :  { %v371_v22 = vpop.f32.mrf.mxu1  ;;  %v789_v57 = vsel %vm776_vm0, %v787_v38, 1.0 }
 0x162   :  { %v994_v23 = vpop.f32.mrf.mxu1 }
 0x168   :  { %v220_v24 = vpop.f32.mrf.mxu0 }
 0x169   :  { %v372_v32 = vadd.f32 %v371_v22, %v220_v24 }
 0x16a   :  { %v959_v25 = vpop.f32.mrf.mxu0 }
 0x180   :  { %v564_v26 = vpop.f32.mrf.mxu1 }
 0x182   :  { %v1064_v27 = vpop.f32.mrf.mxu1 }
 0x189   :  { %v475_v28 = vpop.f32.mrf.mxu0 }
 0x18a   :  { %v476_v34 = vadd.f32 %v475_v28, %v372_v32 }
 0x18b   :  { %v1029_v30 = vpop.f32.mrf.mxu0 }
 0x18c   :  { %v565_v35 = vadd.f32 %v564_v26, %v476_v34 }
 0x1a2   :  { %v770_v31 = vpop.f32.mrf.mxu1 }
 0x1a4   :  { %v1134_v33 = vpop.f32.mrf.mxu1 }
 0x1aa   :  { %v683_v41 = vpop.f32.mrf.mxu0 }
 0x1ab   :  { %v684_v54 = vadd.f32 %v683_v41, %v565_v35 }
 0x1ac   :  { %v1099_v55 = vpop.f32.mrf.mxu0 }
 0x1ad   :  { %v771_v58 = vadd.f32 %v770_v31, %v684_v54 }
 0x1af   :  { %v790_v63 = vmul.f32 %v789_v57, %v771_v58 }
 0x1b1   :  { %v796_v1 = vadd.f32 %v795_v62, %v790_v63 }
 0x1b3   :  { %798 = vst.msk [vmem:[#allocation2] sm:$0xff] %vm797_vm1, %v796_v1 }
 0x1b4   :  { %1183 = shalt.err (!%p1180_p4)
}
 0x1b5   :  { %808 = dma.vmem_to_hbm [thread:$0]  %s806_s20, 128, %s1710_s2, [#allocation3]  }
 0x1b6   :  { %1192 = dma.done.wait [#allocation3], 128  }
 0x1b7   :  { %1193 = vsyncadd [#allocation3], 4294967168 }
 0x1b8   :  { %812 = vsyncpa [#allocation3], 1 }

</bundles_post_ra>
